<compile_context>
chip_gen: v7x
topology: tpu7x:2x2x1
jax: 0.10.0
libtpu: 0.0.40
codegen_flags: <defaults>
</compile_context>

<pallas_src>
import numpy as np
import jax
import jax.numpy as jnp
from jax.experimental import pallas as pl
from jax.experimental.pallas import tpu as pltpu


def _avgpool_matmul_kernel(p_ref, x_ref, o_ref):
    """o = x @ P.  f32 x is split exactly into 3 bf16 terms -> 3 MXU passes."""
    p = p_ref[...]
    x = x_ref[...]
    if x.dtype == jnp.float32 and p.dtype == jnp.bfloat16:
        # Exact 3-term bf16 decomposition of f32 (hi + mid + lo == x in f32
        # arithmetic).  P's entries {0, 0.25} are bf16-exact, so three
        # DEFAULT-precision bf16 passes reproduce the full-f32 product with
        # ~half the MXU work of a Precision.HIGHEST (fp32-contract) matmul.
        # Dots are interleaved with the split so operands can die early
        # (bounds the live VMEM temporaries) and VALU/MXU slots overlap.
        hi = x.astype(jnp.bfloat16)
        acc = jnp.dot(hi, p, preferred_element_type=jnp.float32)
        r = x - hi.astype(jnp.float32)
        mid = r.astype(jnp.bfloat16)
        acc = acc + jnp.dot(mid, p, preferred_element_type=jnp.float32)
        lo = (r - mid.astype(jnp.float32)).astype(jnp.bfloat16)
        acc = acc + jnp.dot(lo, p, preferred_element_type=jnp.float32)
    else:
        # bf16/f16 inputs go straight to the MXU (no upcast temporaries);
        # f32 accumulation via preferred_element_type.
        acc = jnp.dot(x, p, preferred_element_type=jnp.float32)
    o_ref[...] = acc.astype(o_ref.dtype)


def _pool_matrix(H, W, k, dtype):
    """Block-diagonal 2x2-average pooling matrix, built as a host constant."""
    Ho, Wo = H // 2, W // 2
    hw = np.arange(H * W)
    h, w = hw // W, hw % W
    out_idx = (h // 2) * Wo + (w // 2)                                   # (H*W,)
    p1 = (out_idx[:, None] == np.arange(Ho * Wo)[None, :]).astype(np.float32)
    p1 *= 0.25                                                           # (H*W, Ho*Wo)
    p = np.zeros((k * H * W, k * Ho * Wo), dtype=np.float32)
    for j in range(k):
        p[j * H * W:(j + 1) * H * W, j * Ho * Wo:(j + 1) * Ho * Wo] = p1
    return jnp.asarray(p, dtype=dtype)                                   # 0.25 exact in bf16/f16


def down_block(x, *, target_tile_bytes=4 * 1024 * 1024):
    """Equivalent of nn.AvgPool2d(2) on an NCHW input."""
    N, C, H, W = x.shape
    assert H % 2 == 0 and W % 2 == 0, "AvgPool2d(2) here assumes even H, W"
    Ho, Wo = H // 2, W // 2
    NC = N * C

    # Pooling-matrix dtype: bf16 for f32 inputs (exact 3-pass split in-kernel),
    # the input dtype for bf16/f16 (direct single-pass MXU).
    if x.dtype == jnp.float32:
        p_dtype = jnp.bfloat16
    elif x.dtype == jnp.bfloat16 or x.dtype == jnp.float16:
        p_dtype = x.dtype
    else:
        raise NotImplementedError(f"AvgPool2d kernel expects float input, got {x.dtype}")

    # k-way image folding so the output's last dim is lane-dense (>= 128 when
    # possible).  k is the largest divisor of N*C not exceeding ceil(128/(Ho*Wo))
    # (keeps MXU MAC growth minimal; falls back to k=1 if no divisor exists).
    k_want = max(1, -(-128 // (Ho * Wo)))
    k = 1
    for cand in range(min(k_want, NC), 0, -1):
        if NC % cand == 0:
            k = cand
            break
    NCk = NC // k
    kHW, kOW = k * H * W, k * Ho * Wo

    P = _pool_matrix(H, W, k, p_dtype)
    xf = x.reshape(NCk, kHW)            # free contiguous reshape

    # Tile sizing: ~target_tile_bytes of input per grid step, rounded to the
    # dtype's sublane pack, and capped so the parallel axis has >= 2 steps
    # whenever there is enough work (feeds both TensorCores on v7x megacore).
    itemsize = jnp.dtype(x.dtype).itemsize
    pack = max(8, 32 // itemsize)                     # 8 f32, 16 bf16/f16, 32 int8
    tb = max(pack, target_tile_bytes // (kHW * itemsize))
    tb = min(tb, NCk)
    if NCk >= 2 * pack and tb > NCk // 2:
        tb = NCk // 2
    if tb != NCk:
        tb = max(pack, (tb // pack) * pack)
    grid = (pl.cdiv(NCk, tb),)
    # When NCk % tb != 0 the final block reads padded/garbage rows of xf; this
    # is harmless because out-of-range output rows are discarded by Pallas.

    out = pl.pallas_call(
        _avgpool_matmul_kernel,
        out_shape=jax.ShapeDtypeStruct((NCk, kOW), x.dtype),
        grid_spec=pltpu.PrefetchScalarGridSpec(
            num_scalar_prefetch=0,
            grid=grid,
            in_specs=[
                # P: constant index_map -> fetched once and kept resident.
                # TODO(synk): for very large images, P grows as (k*H*W)*(k*Ho*Wo)
                # bytes; single-buffer it (pl.Buffered(1)) and/or switch to a
                # roll + strided-sum VPU variant instead of the matmul form.
                pl.BlockSpec((kHW, kOW), lambda i: (0, 0)),
                pl.BlockSpec((tb, kHW), lambda i: (i, 0)),    # tb folded images
            ],
            out_specs=pl.BlockSpec((tb, kOW), lambda i: (i, 0)),
        ),
        compiler_params=pltpu.CompilerParams(
            dimension_semantics=("parallel",),
            vmem_limit_bytes=48 * 1024 * 1024,
        ),
    )(P, xf)

    return out.reshape(N, C, Ho, Wo)


if __name__ == "__main__":
    key = jax.random.PRNGKey(0)
    x = jax.random.normal(key, (2, 4, 16, 16), dtype=jnp.float32)

    y = jax.block_until_ready(down_block(x))

    # Pure-JAX reference: 2x2 / stride-2 average pooling (same as nn.AvgPool2d(2)).
    N, C, H, W = x.shape
    y_ref = x.reshape(N, C, H // 2, 2, W // 2, 2).mean(axis=(3, 5))

    assert y.shape == (2, 4, 8, 8), y.shape
    assert jnp.allclose(y, y_ref, rtol=1e-5, atol=1e-5), float(jnp.max(jnp.abs(y - y_ref)))

    print("KERNEL_OK")
</pallas_src>

<mosaic_0001>
module attributes {stable_mosaic.version = 11 : i64} {
  func.func @_avgpool_matmul_kernel(%arg0: i32, %arg1: memref<512x128xbf16, #tpu.memory_space<vmem>>, %arg2: memref<4x512xf32, #tpu.memory_space<vmem>>, %arg3: memref<4x128xf32, #tpu.memory_space<vmem>>) attributes {dimension_semantics = [#tpu.dimension_semantics<parallel>], iteration_bounds = array<i64: 1>, scalar_prefetch = 0 : i64, scratch_operands = 0 : i64, tpu.core_type = #tpu.core_type<tc>, window_params = [{pipeline_mode = #tpu.pipeline_mode<synchronous>, transform_indices = @transform_0, window_bounds = array<i64: 512, 128>}, {transform_indices = @transform_1, window_bounds = array<i64: 4, 512>}, {transform_indices = @transform_2, window_bounds = array<i64: 4, 128>}]} {
    %c0 = arith.constant 0 : index
    %c0_0 = arith.constant 0 : index
    %0 = vector.load %arg1[%c0, %c0_0] : memref<512x128xbf16, #tpu.memory_space<vmem>>, vector<512x128xbf16>
    %c0_1 = arith.constant 0 : index
    %c0_2 = arith.constant 0 : index
    %1 = vector.load %arg2[%c0_1, %c0_2] : memref<4x512xf32, #tpu.memory_space<vmem>>, vector<4x512xf32>
    %2 = arith.truncf %1 : vector<4x512xf32> to vector<4x512xbf16>
    %cst = arith.constant dense<0.000000e+00> : vector<4x128xf32>
    %3 = tpu.matmul %2, %0, %cst {dimension_numbers = #tpu.dot_dimension_numbers<[1], [0], [0], [1], [0, 0, 1, 1], [], []>} : vector<4x512xbf16>, vector<512x128xbf16>, vector<4x128xf32> -> vector<4x128xf32>
    %4 = arith.extf %2 : vector<4x512xbf16> to vector<4x512xf32>
    %5 = arith.subf %1, %4 : vector<4x512xf32>
    %6 = arith.truncf %5 : vector<4x512xf32> to vector<4x512xbf16>
    %cst_3 = arith.constant dense<0.000000e+00> : vector<4x128xf32>
    %7 = tpu.matmul %6, %0, %cst_3 {dimension_numbers = #tpu.dot_dimension_numbers<[1], [0], [0], [1], [0, 0, 1, 1], [], []>} : vector<4x512xbf16>, vector<512x128xbf16>, vector<4x128xf32> -> vector<4x128xf32>
    %8 = arith.addf %3, %7 : vector<4x128xf32>
    %9 = arith.extf %6 : vector<4x512xbf16> to vector<4x512xf32>
    %10 = arith.subf %5, %9 : vector<4x512xf32>
    %11 = arith.truncf %10 : vector<4x512xf32> to vector<4x512xbf16>
    %cst_4 = arith.constant dense<0.000000e+00> : vector<4x128xf32>
    %12 = tpu.matmul %11, %0, %cst_4 {dimension_numbers = #tpu.dot_dimension_numbers<[1], [0], [0], [1], [0, 0, 1, 1], [], []>} : vector<4x512xbf16>, vector<512x128xbf16>, vector<4x128xf32> -> vector<4x128xf32>
    %13 = arith.addf %8, %12 : vector<4x128xf32>
    %c0_5 = arith.constant 0 : index
    %c0_6 = arith.constant 0 : index
    %14 = vector.load %arg3[%c0_5, %c0_6] : memref<4x128xf32, #tpu.memory_space<vmem>>, vector<4x128xf32>
    tpu.vector_store %arg3[%c0_5, %c0_6], %13 {strides = array<i32>} : memref<4x128xf32, #tpu.memory_space<vmem>>, vector<4x128xf32>,
    return
  }
  func.func @transform_0(%arg0: i32) -> (i32, i32) {
    %c0_i32 = arith.constant 0 : i32
    %c0_i32_0 = arith.constant 0 : i32
    %c0_i32_1 = arith.constant 0 : i32
    return %c0_i32, %c0_i32_0 : i32, i32
  }
  func.func @transform_1(%arg0: i32) -> (i32, i32) {
    %c0_i32 = arith.constant 0 : i32
    %c0_i32_0 = arith.constant 0 : i32
    return %arg0, %c0_i32 : i32, i32
  }
  func.func @transform_2(%arg0: i32) -> (i32, i32) {
    %c0_i32 = arith.constant 0 : i32
    %c0_i32_0 = arith.constant 0 : i32
    return %arg0, %c0_i32 : i32, i32
  }
}

</mosaic_0001>

<bundles_post_ra>
// kernel: tpu_custom_call.1
= control target key start
LH: loop header
LB: loop body
LE: loop exit
PB: predicated region body
PF: predicated region fallthrough
CT: control target
= control target key end

     0   :  { %7 = vsyncpa [#allocation3], 0  ;;  %s1112_s0 = inlined_call_operand.hbm [shape: bf16[512,128], index: 0, kind: input, shape index: {}]   ;;  %s1113_s1 = inlined_call_operand.hbm [shape: f32[4,512], index: 1, kind: input, shape index: {}]   ;;  %s1114_s2 = inlined_call_operand.hbm [shape: f32[4,128], index: 2, kind: output, shape index: {}]  }
   0x1   :  { %8 = vsyncpa [#allocation6], 0 }
   0x2   :  { %9 = vsyncpa [#allocation4], 0  ;;  %s888_s9 = smov [#allocation2]   ;;  %s816_s13 = scalar_lea.hbm %s1112_s0, 4096 }
   0x3   :  { %s15_s10 = sshll.u32 %s888_s9, 4  ;;  %p817_p0 = scmp.ne.s32.totalorder %s1112_s0, %s816_s13  ;;  %s16_s10 = int_to_ptr.vmem [resolvable:$true] %s15_s10 }
   0x4   :  { %p820_p1 = scmp.lt.u32.totalorder %s816_s13, %s1112_s0 }
   0x6   :  { %p822_p2 = pnand %p820_p1, %p817_p0 }
   0x8   :  { %825 = shalt.err (!%p822_p2)
}
   0x9   :  { %s826_s18 = scalar_lea.vmem %s16_s10, 4096  ;;  %p831_p4 = scmp.lt.s32.totalorder %s16_s10, %s16_s10 }
   0xa   :  { %p827_p3 = scmp.ne.s32.totalorder %s16_s10, %s826_s18  ;;  %p832_p5 = scmp.lt.s32.totalorder %s826_s18, %s826_s18 }
   0xc   :  { %p833_p6 = por %p832_p5, %p831_p4 }
   0xe   :  { %p834_p7 = pnand %p833_p6, %p827_p3 }
  0x10   :  { %837 = shalt.err (!%p834_p7)
}
  0x11   :  { %s889_s19 = smov 64   ;;  %s890_s20 = smov 4  }
  0x12   :  { %21 = dma.hbm_to_vmem [thread:$0]  %s1112_s0, 4096, %s16_s10, [#allocation3], %s889_s19, %s889_s19, %s890_s20  }
  0x13   :  { %s891_s23 = smov [#allocation5]   ;;  %s838_s27 = scalar_lea.hbm %s1113_s1, 256 }
  0x14   :  { %s28_s24 = sshll.u32 %s891_s23, 4  ;;  %p839_p8 = scmp.ne.s32.totalorder %s1113_s1, %s838_s27  ;;  %s29_s24 = int_to_ptr.vmem [resolvable:$true] %s28_s24 }
  0x15   :  { %p842_p9 = scmp.lt.u32.totalorder %s838_s27, %s1113_s1 }
  0x17   :  { %p844_p10 = pnand %p842_p9, %p839_p8 }
  0x19   :  { %847 = shalt.err (!%p844_p10)
}
  0x1a   :  { %s848_s4 = scalar_lea.vmem %s29_s24, 256  ;;  %p853_p12 = scmp.lt.s32.totalorder %s29_s24, %s29_s24 }
  0x1b   :  { %p849_p11 = scmp.ne.s32.totalorder %s29_s24, %s848_s4  ;;  %p854_p13 = scmp.lt.s32.totalorder %s848_s4, %s848_s4 }
  0x1d   :  { %p855_p0 = por %p854_p13, %p853_p12 }
  0x1f   :  { %p856_p1 = pnand %p855_p0, %p849_p11 }
  0x21   :  { %859 = shalt.err (!%p856_p1)
}
  0x22   :  { %31 = dma.hbm_to_vmem [thread:$0]  %s1113_s1, 256, %s29_s24, [#allocation6]  }
  0x23   :  { %882 = dma.done.wait [#allocation3], 4096  }
  0x24   :  { %883 = vsyncadd [#allocation3], 4294963200 }
  0x25   :  { %884 = dma.done.wait [#allocation6], 256  }
  0x26   :  { %885 = vsyncadd [#allocation6], 4294967040  ;;  %v932_v0 = vld [vmem:[#allocation2 + $0x40] sm:$0xff]   ;;  %v943_v4 = vld [vmem:[#allocation2 + $0x48] sm:$0xff]   ;;  %s892_s1 = smov [#allocation7]  }
  0x27   :  { %v934_v1 = vld [vmem:[#allocation2 + $0xc0] sm:$0xff]   ;;  %645 = vmatprep.subr.bf16.mxu0 %v932_v0  ;;  %v946_v5 = vld [vmem:[#allocation2 + $0xc8] sm:$0xff]   ;;  %v955_v8 = vld [vmem:[#allocation2 + $0x50] sm:$0xff]   ;;  %s603_s6 = sshll.u32 %s892_s1, 4  ;;  %s604_s6 = int_to_ptr.vmem [resolvable:$true] %s603_s6 }
  0x28   :  { %v937_v2 = vld [vmem:[#allocation2] sm:$0xff]   ;;  %667 = vmatprep.subr.bf16.mxu1 %v934_v1  ;;  %v949_v6 = vld [vmem:[#allocation2 + $0x8] sm:$0xff]   ;;  %v958_v9 = vld [vmem:[#allocation2 + $0xd0] sm:$0xff]   ;;  %s860_s7 = scalar_lea.vmem %s604_s6, 64  ;;  %p865_p3 = scmp.lt.s32.totalorder %s604_s6, %s604_s6 }
  0x29   :  { %v940_v3 = vld [vmem:[#allocation2 + $0x80] sm:$0xff]   ;;  %646 = vmatpush3.bf16.msra.mxu0 %v937_v2  ;;  %v952_v7 = vld [vmem:[#allocation2 + $0x88] sm:$0xff]   ;;  %v961_v10 = vld [vmem:[#allocation2 + $0x10] sm:$0xff]   ;;  %p861_p2 = scmp.ne.s32.totalorder %s604_s6, %s860_s7  ;;  %p866_p4 = scmp.lt.s32.totalorder %s860_s7, %s860_s7 }
  0x2a   :  { %668 = vmatpush3.bf16.msra.mxu1 %v940_v3  ;;  %647 = vmatprep.subr.bf16.mxu0 %v943_v4  ;;  %v964_v11 = vld [vmem:[#allocation2 + $0x90] sm:$0xff]   ;;  %v967_v12 = vld [vmem:[#allocation2 + $0x58] sm:$0xff]   ;;  %v979_v16 = vld [vmem:[#allocation2 + $0x60] sm:$0xff]  }
  0x2b   :  { %669 = vmatprep.subr.bf16.mxu1 %v946_v5  ;;  %v970_v13 = vld [vmem:[#allocation2 + $0xd8] sm:$0xff]   ;;  %v982_v17 = vld [vmem:[#allocation2 + $0xe0] sm:$0xff]   ;;  %v991_v20 = vld [vmem:[#allocation2 + $0x68] sm:$0xff]   ;;  %p867_p5 = por %p866_p4, %p865_p3 }
  0x2c   :  { %v973_v14 = vld [vmem:[#allocation2 + $0x18] sm:$0xff]   ;;  %v985_v18 = vld [vmem:[#allocation2 + $0x20] sm:$0xff]   ;;  %v994_v21 = vld [vmem:[#allocation2 + $0xe8] sm:$0xff]  }
  0x2d   :  { %648 = vmatpush3.bf16.msra.mxu0 %v949_v6  ;;  %v976_v15 = vld [vmem:[#allocation2 + $0x98] sm:$0xff]   ;;  %v988_v19 = vld [vmem:[#allocation2 + $0xa0] sm:$0xff]   ;;  %v997_v22 = vld [vmem:[#allocation2 + $0x28] sm:$0xff]   ;;  %p868_p6 = pnand %p867_p5, %p861_p2 }
  0x2e   :  { %670 = vmatpush3.bf16.msra.mxu1 %v952_v7  ;;  %649 = vmatprep.subr.bf16.mxu0 %v955_v8  ;;  %v1000_v23 = vld [vmem:[#allocation2 + $0xa8] sm:$0xff]   ;;  %v1003_v24 = vld [vmem:[#allocation2 + $0x70] sm:$0xff]   ;;  %v1015_v28 = vld [vmem:[#allocation2 + $0x78] sm:$0xff]  }
  0x2f   :  { %671 = vmatprep.subr.bf16.mxu1 %v958_v9  ;;  %v1006_v25 = vld [vmem:[#allocation2 + $0xf0] sm:$0xff]   ;;  %v1018_v29 = vld [vmem:[#allocation2 + $0xf8] sm:$0xff]   ;;  %v103_v32 = vld [vmem:[#allocation5] sm:$0xff] }
  0x30   :  { %v1009_v26 = vld [vmem:[#allocation2 + $0x30] sm:$0xff]   ;;  %v1021_v30 = vld [vmem:[#allocation2 + $0x38] sm:$0xff]   ;;  %v104_v33 = vld [vmem:[#allocation5 + $0x8] sm:$0xff]  ;;  %v107_v34 = vcombine.high %v103_v32, %v103_v32  ;;  %v1028_v35 = vpack.c.bf16 %v103_v32, %v103_v32 }
  0x31   :  { %650 = vmatpush3.bf16.msra.mxu0 %v961_v10  ;;  %v1012_v27 = vld [vmem:[#allocation2 + $0xb0] sm:$0xff]   ;;  %v1024_v31 = vld [vmem:[#allocation2 + $0xb8] sm:$0xff]   ;;  %v108_v36 = vcombine.high %v104_v33, %v104_v33  ;;  %v1030_v37 = vpack.c.bf16 %v104_v33, %v104_v33 }
  0x32   :  { %672 = vmatpush3.bf16.msra.mxu1 %v964_v11  ;;  %651 = vmatprep.subr.bf16.mxu0 %v967_v12  ;;  %v112_v38 = vpack.c.bf16 %v107_v34, %v107_v34  ;;  %v115_v39 = vunpack.c.l.bf16 %v1028_v35 }
  0x33   :  { %673 = vmatprep.subr.bf16.mxu1 %v970_v13  ;;  %v114_v40 = vpack.c.bf16 %v108_v36, %v108_v36  ;;  %v117_v41 = vunpack.c.l.bf16 %v1030_v37 }
  0x34   :  { %v116_v42 = vunpack.c.l.bf16 %v112_v38 }
  0x35   :  { %652 = vmatpush3.bf16.msra.mxu0 %v973_v14  ;;  %v118_v43 = vunpack.c.l.bf16 %v114_v40 }
  0x36   :  { %674 = vmatpush3.bf16.msra.mxu1 %v976_v15  ;;  %653 = vmatprep.subr.bf16.mxu0 %v979_v16  ;;  %v123_v44 = vcombine.low %v115_v39, %v116_v42 }
  0x37   :  { %675 = vmatprep.subr.bf16.mxu1 %v982_v17  ;;  %v124_v45 = vcombine.low %v117_v41, %v118_v43 }
  0x38   :  { %v127_v46 = vsub.f32 %v103_v32, %v123_v44 }
  0x39   :  { %654 = vmatpush3.bf16.msra.mxu0 %v985_v18  ;;  %v128_v47 = vsub.f32 %v104_v33, %v124_v45 }
  0x3a   :  { %676 = vmatpush3.bf16.msra.mxu1 %v988_v19  ;;  %655 = vmatprep.subr.bf16.mxu0 %v991_v20  ;;  %v131_v48 = vcombine.high %v127_v46, %v127_v46  ;;  %v135_v50 = vpack.c.bf16 %v127_v46, %v127_v46 }
  0x3b   :  { %677 = vmatprep.subr.bf16.mxu1 %v994_v21  ;;  %v132_v49 = vcombine.high %v128_v47, %v128_v47  ;;  %v137_v51 = vpack.c.bf16 %v128_v47, %v128_v47 }
  0x3c   :  { %v136_v52 = vpack.c.bf16 %v131_v48, %v131_v48  ;;  %v491_v56 = vunpack.c.l.bf16 %v135_v50 }
  0x3d   :  { %656 = vmatpush3.bf16.msra.mxu0 %v997_v22  ;;  %v138_v53 = vpack.c.bf16 %v132_v49, %v132_v49  ;;  %v493_v57 = vunpack.c.l.bf16 %v137_v51 }
  0x3e   :  { %678 = vmatpush3.bf16.msra.mxu1 %v1000_v23  ;;  %657 = vmatprep.subr.bf16.mxu0 %v1003_v24  ;;  %v492_v54 = vunpack.c.l.bf16 %v136_v52 }
  0x3f   :  { %679 = vmatprep.subr.bf16.mxu1 %v1006_v25  ;;  %363 = vmatprep.mubr.bf16.mxu0 %v136_v52  ;;  %v494_v55 = vunpack.c.l.bf16 %v138_v53 }
  0x40   :  { %403 = vmatprep.mubr.bf16.mxu1 %v138_v53  ;;  %v499_v58 = vcombine.low %v491_v56, %v492_v54 }
  0x41   :  { %658 = vmatpush3.bf16.msra.mxu0 %v1009_v26  ;;  %v500_v59 = vcombine.low %v493_v57, %v494_v55 }
  0x42   :  { %680 = vmatpush3.bf16.msra.mxu1 %v1012_v27  ;;  %659 = vmatprep.subr.bf16.mxu0 %v1015_v28  ;;  %v503_v60 = vsub.f32 %v127_v46, %v499_v58 }
  0x43   :  { %681 = vmatprep.subr.bf16.mxu1 %v1018_v29  ;;  %v504_v61 = vsub.f32 %v128_v47, %v500_v59 }
  0x44   :  { %v507_v62 = vcombine.high %v503_v60, %v503_v60 }
  0x45   :  { %660 = vmatpush3.bf16.msra.mxu0 %v1021_v30  ;;  %v508_v63 = vcombine.high %v504_v61, %v504_v61 }
  0x46   :  { %682 = vmatpush3.bf16.msra.mxu1 %v1024_v31  ;;  %689 = vmatprep.subr.bf16.mxu0 %v932_v0  ;;  %v512_v32 = vpack.c.bf16 %v507_v62, %v507_v62 }
  0x47   :  { %711 = vmatprep.subr.bf16.mxu1 %v934_v1  ;;  %v514_v33 = vpack.c.bf16 %v508_v63, %v508_v63 }
  0x48   :  { %364 = vmatmul.mubr.bf16.vlgmr.msra.gmra.mrb[0].mxu0 %v135_v50 }
  0x49   :  { %404 = vmatmul.mubr.bf16.vlgmr.msra.gmra.mrb[0].mxu1 %v137_v51  ;;  %690 = vmatpush3.bf16.msra.mxu0 %v937_v2 }
  0x4a   :  { %712 = vmatpush3.bf16.msra.mxu1 %v940_v3  ;;  %691 = vmatprep.subr.bf16.mxu0 %v943_v4 }
  0x4b   :  { %713 = vmatprep.subr.bf16.mxu1 %v946_v5  ;;  %443 = vmatprep.mubr.bf16.mxu0 %v112_v38 }
  0x4c   :  { %483 = vmatprep.mubr.bf16.mxu1 %v114_v40 }
  0x4d   :  { %692 = vmatpush3.bf16.msra.mxu0 %v949_v6 }
  0x4e   :  { %714 = vmatpush3.bf16.msra.mxu1 %v952_v7  ;;  %693 = vmatprep.subr.bf16.mxu0 %v955_v8 }
  0x4f   :  { %715 = vmatprep.subr.bf16.mxu1 %v958_v9 }
  0x51   :  { %694 = vmatpush3.bf16.msra.mxu0 %v961_v10 }
  0x52   :  { %716 = vmatpush3.bf16.msra.mxu1 %v964_v11  ;;  %695 = vmatprep.subr.bf16.mxu0 %v967_v12 }
  0x53   :  { %717 = vmatprep.subr.bf16.mxu1 %v970_v13 }
  0x55   :  { %696 = vmatpush3.bf16.msra.mxu0 %v973_v14 }
  0x56   :  { %718 = vmatpush3.bf16.msra.mxu1 %v976_v15  ;;  %697 = vmatprep.subr.bf16.mxu0 %v979_v16 }
  0x57   :  { %719 = vmatprep.subr.bf16.mxu1 %v982_v17 }
  0x59   :  { %698 = vmatpush3.bf16.msra.mxu0 %v985_v18 }
  0x5a   :  { %720 = vmatpush3.bf16.msra.mxu1 %v988_v19  ;;  %699 = vmatprep.subr.bf16.mxu0 %v991_v20 }
  0x5b   :  { %721 = vmatprep.subr.bf16.mxu1 %v994_v21 }
  0x5d   :  { %700 = vmatpush3.bf16.msra.mxu0 %v997_v22 }
  0x5e   :  { %722 = vmatpush3.bf16.msra.mxu1 %v1000_v23  ;;  %701 = vmatprep.subr.bf16.mxu0 %v1003_v24 }
  0x5f   :  { %723 = vmatprep.subr.bf16.mxu1 %v1006_v25 }
  0x61   :  { %702 = vmatpush3.bf16.msra.mxu0 %v1009_v26 }
  0x62   :  { %724 = vmatpush3.bf16.msra.mxu1 %v1012_v27  ;;  %703 = vmatprep.subr.bf16.mxu0 %v1015_v28 }
  0x63   :  { %725 = vmatprep.subr.bf16.mxu1 %v1018_v29 }
  0x65   :  { %704 = vmatpush3.bf16.msra.mxu0 %v1021_v30 }
  0x66   :  { %726 = vmatpush3.bf16.msra.mxu1 %v1024_v31  ;;  %733 = vmatprep.subr.bf16.mxu0 %v932_v0  ;;  %v511_v0 = vpack.c.bf16 %v503_v60, %v503_v60 }
  0x67   :  { %755 = vmatprep.subr.bf16.mxu1 %v934_v1  ;;  %v513_v1 = vpack.c.bf16 %v504_v61, %v504_v61 }
  0x68   :  { %444 = vmatmul.mubr.bf16.vlgmr.msra.gmra.mrb[4].mxu0 %v1028_v35 }
  0x69   :  { %484 = vmatmul.mubr.bf16.vlgmr.msra.gmra.mrb[4].mxu1 %v1030_v37  ;;  %734 = vmatpush3.bf16.msra.mxu0 %v937_v2 }
  0x6a   :  { %756 = vmatpush3.bf16.msra.mxu1 %v940_v3  ;;  %735 = vmatprep.subr.bf16.mxu0 %v943_v4 }
  0x6b   :  { %757 = vmatprep.subr.bf16.mxu1 %v946_v5  ;;  %547 = vmatprep.mubr.bf16.mxu0 %v512_v32 }
  0x6c   :  { %587 = vmatprep.mubr.bf16.mxu1 %v514_v33 }
  0x6d   :  { %736 = vmatpush3.bf16.msra.mxu0 %v949_v6 }
  0x6e   :  { %758 = vmatpush3.bf16.msra.mxu1 %v952_v7  ;;  %737 = vmatprep.subr.bf16.mxu0 %v955_v8 }
  0x6f   :  { %759 = vmatprep.subr.bf16.mxu1 %v958_v9 }
  0x71   :  { %738 = vmatpush3.bf16.msra.mxu0 %v961_v10 }
  0x72   :  { %760 = vmatpush3.bf16.msra.mxu1 %v964_v11  ;;  %739 = vmatprep.subr.bf16.mxu0 %v967_v12 }
  0x73   :  { %761 = vmatprep.subr.bf16.mxu1 %v970_v13 }
  0x75   :  { %740 = vmatpush3.bf16.msra.mxu0 %v973_v14 }
  0x76   :  { %762 = vmatpush3.bf16.msra.mxu1 %v976_v15  ;;  %741 = vmatprep.subr.bf16.mxu0 %v979_v16 }
  0x77   :  { %763 = vmatprep.subr.bf16.mxu1 %v982_v17 }
  0x79   :  { %742 = vmatpush3.bf16.msra.mxu0 %v985_v18 }
  0x7a   :  { %764 = vmatpush3.bf16.msra.mxu1 %v988_v19  ;;  %743 = vmatprep.subr.bf16.mxu0 %v991_v20 }
  0x7b   :  { %765 = vmatprep.subr.bf16.mxu1 %v994_v21 }
  0x7d   :  { %744 = vmatpush3.bf16.msra.mxu0 %v997_v22 }
  0x7e   :  { %766 = vmatpush3.bf16.msra.mxu1 %v1000_v23  ;;  %745 = vmatprep.subr.bf16.mxu0 %v1003_v24 }
  0x7f   :  { %767 = vmatprep.subr.bf16.mxu1 %v1006_v25 }
  0x81   :  { %746 = vmatpush3.bf16.msra.mxu0 %v1009_v26 }
  0x82   :  { %768 = vmatpush3.bf16.msra.mxu1 %v1012_v27  ;;  %747 = vmatprep.subr.bf16.mxu0 %v1015_v28 }
  0x83   :  { %769 = vmatprep.subr.bf16.mxu1 %v1018_v29 }
  0x85   :  { %748 = vmatpush3.bf16.msra.mxu0 %v1021_v30 }
  0x86   :  { %770 = vmatpush3.bf16.msra.mxu1 %v1024_v31 }
  0x88   :  { %548 = vmatmul.mubr.bf16.vlgmr.msra.gmra.mrb[8].mxu0 %v511_v0 }
  0x89   :  { %588 = vmatmul.mubr.bf16.vlgmr.msra.gmra.mrb[8].mxu1 %v513_v1 }
 0x11b   :  { %v661_v2 = vpop.f32.mrb[0].mxu0 }
 0x11c   :  { %v683_v3 = vpop.f32.mrb[0].mxu1  ;;  %v662_v4 = vpop.f32.mrb[1].mxu0 }
 0x11d   :  { %v684_v5 = vpop.f32.mrb[1].mxu1  ;;  %v663_v6 = vadd.f32 %v662_v4, %v661_v2  ;;  %v664_v8 = vpop.f32.mrb[2].mxu0 }
 0x11e   :  { %v685_v7 = vadd.f32 %v684_v5, %v683_v3  ;;  %v686_v9 = vpop.f32.mrb[2].mxu1  ;;  %v665_v10 = vpop.f32.mrb[3].mxu0 }
 0x11f   :  { %v687_v11 = vpop.f32.mrb[3].mxu1 }
 0x120   :  { %v406_v12 = vadd.f32 %v685_v7, %v663_v6 }
 0x13b   :  { %v705_v13 = vpop.f32.mrb[4].mxu0 }
 0x13c   :  { %v727_v14 = vpop.f32.mrb[4].mxu1  ;;  %v706_v15 = vpop.f32.mrb[5].mxu0 }
 0x13d   :  { %v728_v16 = vpop.f32.mrb[5].mxu1  ;;  %v707_v17 = vadd.f32 %v706_v15, %v705_v13  ;;  %v708_v19 = vpop.f32.mrb[6].mxu0 }
 0x13e   :  { %v729_v18 = vadd.f32 %v728_v16, %v727_v14  ;;  %v730_v20 = vpop.f32.mrb[6].mxu1  ;;  %v709_v21 = vpop.f32.mrb[7].mxu0 }
 0x13f   :  { %v731_v22 = vpop.f32.mrb[7].mxu1  ;;  %v446_v23 = vadd.f32 %v707_v17, %v406_v12 }
 0x141   :  { %v486_v24 = vadd.f32 %v729_v18, %v446_v23 }
 0x15b   :  { %v749_v25 = vpop.f32.mrb[8].mxu0 }
 0x15c   :  { %v771_v26 = vpop.f32.mrb[8].mxu1  ;;  %v750_v27 = vpop.f32.mrb[9].mxu0 }
 0x15d   :  { %v772_v28 = vpop.f32.mrb[9].mxu1  ;;  %v751_v29 = vadd.f32 %v750_v27, %v749_v25  ;;  %v752_v31 = vpop.f32.mrb[10].mxu0 }
 0x15e   :  { %v773_v30 = vadd.f32 %v772_v28, %v771_v26  ;;  %v774_v34 = vpop.f32.mrb[10].mxu1  ;;  %v753_v35 = vpop.f32.mrb[11].mxu0 }
 0x15f   :  { %v775_v36 = vpop.f32.mrb[11].mxu1 }
 0x160   :  { %v590_v37 = vadd.f32 %v773_v30, %v751_v29 }
 0x162   :  { %v595_v38 = vadd.f32 %v590_v37, %v486_v24 }
 0x164   :  { %596 = vst [vmem:[#allocation7] sm:$0xf] %v595_v38 }
 0x165   :  { %871 = shalt.err (!%p868_p6)
}
 0x166   :  { %s872_s10 = scalar_lea.hbm %s1114_s2, 64 }
 0x167   :  { %p873_p7 = scmp.ne.s32.totalorder %s1114_s2, %s872_s10  ;;  %p876_p8 = scmp.lt.u32.totalorder %s872_s10, %s1114_s2 }
 0x169   :  { %p878_p9 = pnand %p876_p8, %p873_p7 }
 0x16b   :  { %881 = shalt.err (!%p878_p9)
}
 0x16c   :  { %606 = dma.vmem_to_hbm [thread:$0]  %s604_s6, 64, %s1114_s2, [#allocation4]  }
 0x16d   :  { %886 = dma.done.wait [#allocation4], 64  }
 0x16e   :  { %887 = vsyncadd [#allocation4], 4294967232 }
 0x16f   :  { %610 = vsyncpa [#allocation3], 1 }
 0x170   :  { %611 = vsyncpa [#allocation6], 1 }
 0x171   :  { %612 = vsyncpa [#allocation4], 1 }

</bundles_post_ra>
